<compile_context>
chip_gen: v6e
topology: v6e:2x2x1
jax: 0.10.0
libtpu: 0.0.40
codegen_flags: <defaults>
</compile_context>

<pallas_src>
import jax
import jax.numpy as jnp
from jax.experimental import pallas as pl
from jax.experimental.pallas import tpu as pltpu


# ----------------------------- Fused Pallas kernel ------------------------------ #

def _feature_transform(h, w):
    """(GB, N, Fin) @ (Fin, Fout) -> (GB, N, Fout); flattened to one 2-D MXU matmul when legal."""
    gb, n, fin = h.shape
    fout = w.shape[1]
    if n % 8 == 0:
        # Collapsing (GB, N) is a sublane-only relayout (N is a sublane multiple) -> free, and the
        # MXU sees one (GB*N, Fin) x (Fin, Fout) matmul instead of GB tiny batched ones.
        return jnp.dot(h.reshape(gb * n, fin), w,
                       preferred_element_type=jnp.float32).reshape(gb, n, fout)
    return jnp.einsum("gnf,fo->gno", h, w, preferred_element_type=jnp.float32)


def fused_gcn_classifier_kernel(a_ref, x_ref, w1_ref, b1_ref, w2_ref, b2_ref,
                                wc_ref, bc_ref, o_ref):
    """Process GB graphs: 2x (mean-aggregate + Linear + ReLU) -> mean_nodes -> Linear -> softmax."""
    # Adjacency arrives in bf16 (exact for 0/1); compute in f32.
    a = a_ref[...].astype(jnp.float32)                       # (GB, N, N), a[g, dst, src]
    # Normalize the adjacency ONCE and reuse for both layers (mean over in-neighbors).
    deg = jnp.sum(a, axis=-1, keepdims=True)                 # in-degree per node, (GB, N, 1)
    # TODO(synk): DGL leaves zero-in-degree nodes untouched by the mean-reduce; we clamp deg>=1
    # (harmless here: the test graphs include self-loops so every node has an in-neighbor).
    inv_deg = pl.reciprocal(jnp.maximum(deg, 1.0), approx=True)   # EUP slot, ~free vs VALU
    a_norm = a * inv_deg                                     # (GB, N, N)

    h = x_ref[...].astype(jnp.float32)                       # (GB, N, Fin)
    n_nodes = h.shape[1]

    for w_ref, b_ref in ((w1_ref, b1_ref), (w2_ref, b2_ref)):
        w = w_ref[...]                                       # (Fin_l, Fout_l)
        fin, fout = w.shape
        if fout < fin:
            # Layer narrows: A_norm @ (H @ W) has fewer FLOPs (N^2*Fout term instead of N^2*Fin).
            hw = _feature_transform(h, w)
            z = jnp.einsum("gij,gjo->gio", a_norm, hw, preferred_element_type=jnp.float32)
        else:
            agg = jnp.einsum("gij,gjf->gif", a_norm, h, preferred_element_type=jnp.float32)
            z = _feature_transform(agg, w)
        h = jnp.maximum(z + b_ref[...], 0.0)                 # ReLU; bias (1, Fout_l) broadcasts

    # Readout (dgl.mean_nodes) + classifier + softmax(dim=1).
    # NOTE: the sublane reduce over N runs on the XLU slot; MXU work dominates at these sizes.
    hg = jnp.sum(h, axis=1) * (1.0 / n_nodes)                # (GB, H)
    logits = jnp.dot(hg, wc_ref[...], preferred_element_type=jnp.float32) + bc_ref[...]
    # Padded classifier lanes carry bias = -1e30 -> exp underflows to exactly 0, so the softmax
    # over the padded 128-wide slab equals the softmax over the real C classes.
    m = jnp.max(logits, axis=-1, keepdims=True)
    e = jnp.exp(logits - m)
    o_ref[...] = e * pl.reciprocal(jnp.sum(e, axis=-1, keepdims=True), approx=True)


# ------------------------------ Wrapper ----------------------------------- #

def gcn_classifier_forward(adj, x, params, *, graphs_per_step=None):
    """adj: (B,N,N) f32 (a[b,dst,src]=1 iff edge src->dst), x: (B,N,in_dim) -> softmax probs (B,C)."""
    B, N, Fin = x.shape
    (w1, b1), (w2, b2) = params["layers"]
    wc, bc = params["classify"]
    H = w1.shape[1]
    C = wc.shape[1]
    CPAD = ((C + 127) // 128) * 128                          # lane-dense output slab

    # Classifier padded to 128 lanes: zero weight columns, -1e30 bias on padded lanes.
    wc_p = jnp.zeros((H, CPAD), jnp.float32).at[:, :C].set(wc)
    bc_p = jnp.full((1, CPAD), -1e30, jnp.float32).at[0, :C].set(bc)

    # Adjacency shipped in bf16 (0/1 values are exact) -> half the DMA bytes of the biggest tensor.
    adj_bf16 = adj.astype(jnp.bfloat16)

    # Graphs per grid step: fill the batch tile while keeping the out-block sublane dim legal
    # (second-to-last block dim must be a multiple of 8 or equal the full batch).
    if graphs_per_step is None:
        graphs_per_step = B if (B <= 8 or B % 8 != 0) else 8
    GB = graphs_per_step
    assert B % GB == 0, "batch must be divisible by graphs_per_step"
    grid = (B // GB,)

    out_padded = pl.pallas_call(
        fused_gcn_classifier_kernel,
        out_shape=jax.ShapeDtypeStruct((B, CPAD), jnp.float32),
        grid_spec=pltpu.PrefetchScalarGridSpec(
            num_scalar_prefetch=0,
            grid=grid,
            in_specs=[
                pl.BlockSpec((GB, N, N), lambda i: (i, 0, 0)),      # adjacency (bf16)
                pl.BlockSpec((GB, N, Fin), lambda i: (i, 0, 0)),    # node features
                pl.BlockSpec((Fin, H), lambda i: (0, 0)),           # layer-1 weight (VMEM-resident)
                pl.BlockSpec((1, H), lambda i: (0, 0)),             # layer-1 bias
                pl.BlockSpec((H, H), lambda i: (0, 0)),             # layer-2 weight
                pl.BlockSpec((1, H), lambda i: (0, 0)),             # layer-2 bias
                pl.BlockSpec((H, CPAD), lambda i: (0, 0)),          # classifier weight (padded)
                pl.BlockSpec((1, CPAD), lambda i: (0, 0)),          # classifier bias (padded)
            ],
            out_specs=pl.BlockSpec((GB, CPAD), lambda i: (i, 0)),   # lane-dense output
        ),
        # Batch axis is "parallel" so it can shard across v7x's two TensorCores when B is large.
        # NOTE: if N grows, tile the (N,N) adjacency along dst and raise vmem_limit_bytes so
        # double-buffered blocks fit VMEM (64 MiB on v7x, 16 MiB scoped default on v5e).
        compiler_params=pltpu.CompilerParams(dimension_semantics=("parallel",)),
    )(adj_bf16, x, w1, b1.reshape(1, H), w2, b2.reshape(1, H), wc_p, bc_p)

    return out_padded[:, :C]


# ------------------------- Parameter initialization ------------------------ #

def init_params(key, in_dim, hidden_dim, n_class):
    ks = jax.random.split(key, 6)

    def linear(kw, kb, fin, fout):
        # torch nn.Linear weight is (fout, fin); we store its transpose (fin, fout).
        w = jax.random.normal(kw, (fout, fin), jnp.float32) * (1.0 / jnp.sqrt(fin))
        b = jax.random.normal(kb, (fout,), jnp.float32) * 0.01
        return w.T, b

    return {
        "layers": [
            linear(ks[0], ks[1], in_dim, hidden_dim),
            linear(ks[2], ks[3], hidden_dim, hidden_dim),
        ],
        "classify": linear(ks[4], ks[5], hidden_dim, n_class),
    }


# ------------------------------ Reference ---------------------------------- #

def reference_forward(adj, x, params):
    h = x
    for (w_t, b) in params["layers"]:
        deg = jnp.maximum(jnp.sum(adj, axis=-1, keepdims=True), 1.0)
        agg = jnp.einsum("bij,bjf->bif", adj, h) / deg
        h = jax.nn.relu(jnp.einsum("bnf,fo->bno", agg, w_t) + b)
    hg = jnp.mean(h, axis=1)
    logits = hg @ params["classify"][0] + params["classify"][1]
    return jax.nn.softmax(logits, axis=1)


# --------------------------------- Main ------------------------------------ #

if __name__ == "__main__":
    B, N = 2, 8           # 2 graphs, 8 nodes each
    in_dim, hidden_dim, n_class = 16, 32, 4

    key = jax.random.PRNGKey(0)
    k_adj, k_x, k_p = jax.random.split(key, 3)

    # Random directed adjacency with self-loops (so every node has >=1 in-neighbor).
    adj = (jax.random.uniform(k_adj, (B, N, N)) < 0.3).astype(jnp.float32)
    eye = jnp.broadcast_to(jnp.eye(N, dtype=jnp.float32), (B, N, N))
    adj = jnp.maximum(adj, eye)

    x = jax.random.normal(k_x, (B, N, in_dim), jnp.float32)
    params = init_params(k_p, in_dim, hidden_dim, n_class)

    out = gcn_classifier_forward(adj, x, params)
    out = jax.block_until_ready(out)

    ref = reference_forward(adj, x, params)
    assert out.shape == (B, n_class)
    # Tolerance covers the approximate (EUP) reciprocal used for 1/deg and the softmax denom.
    assert jnp.allclose(jnp.sum(out, axis=1), 1.0, atol=5e-3)
    assert jnp.allclose(out, ref, atol=5e-3, rtol=5e-3)

    print("KERNEL_OK")
</pallas_src>

<mosaic_0001>
module attributes {stable_mosaic.version = 11 : i64} {
  func.func @fused_gcn_classifier_kernel(%arg0: i32, %arg1: memref<2x8x8xbf16, #tpu.memory_space<vmem>>, %arg2: memref<2x8x16xf32, #tpu.memory_space<vmem>>, %arg3: memref<16x32xf32, #tpu.memory_space<vmem>>, %arg4: memref<1x32xf32, #tpu.memory_space<vmem>>, %arg5: memref<32x32xf32, #tpu.memory_space<vmem>>, %arg6: memref<1x32xf32, #tpu.memory_space<vmem>>, %arg7: memref<32x128xf32, #tpu.memory_space<vmem>>, %arg8: memref<1x128xf32, #tpu.memory_space<vmem>>, %arg9: memref<2x128xf32, #tpu.memory_space<vmem>>) attributes {dimension_semantics = [#tpu.dimension_semantics<parallel>], iteration_bounds = array<i64: 1>, scalar_prefetch = 0 : i64, scratch_operands = 0 : i64, tpu.core_type = #tpu.core_type<tc>, window_params = [{transform_indices = @transform_0, window_bounds = array<i64: 2, 8, 8>}, {transform_indices = @transform_1, window_bounds = array<i64: 2, 8, 16>}, {pipeline_mode = #tpu.pipeline_mode<synchronous>, transform_indices = @transform_2, window_bounds = array<i64: 16, 32>}, {pipeline_mode = #tpu.pipeline_mode<synchronous>, transform_indices = @transform_3, window_bounds = array<i64: 1, 32>}, {pipeline_mode = #tpu.pipeline_mode<synchronous>, transform_indices = @transform_4, window_bounds = array<i64: 32, 32>}, {pipeline_mode = #tpu.pipeline_mode<synchronous>, transform_indices = @transform_5, window_bounds = array<i64: 1, 32>}, {pipeline_mode = #tpu.pipeline_mode<synchronous>, transform_indices = @transform_6, window_bounds = array<i64: 32, 128>}, {pipeline_mode = #tpu.pipeline_mode<synchronous>, transform_indices = @transform_7, window_bounds = array<i64: 1, 128>}, {transform_indices = @transform_8, window_bounds = array<i64: 2, 128>}]} {
    %c0 = arith.constant 0 : index
    %c0_0 = arith.constant 0 : index
    %c0_1 = arith.constant 0 : index
    %0 = vector.load %arg1[%c0, %c0_0, %c0_1] : memref<2x8x8xbf16, #tpu.memory_space<vmem>>, vector<2x8x8xbf16>
    %1 = arith.extf %0 : vector<2x8x8xbf16> to vector<2x8x8xf32>
    %cst = arith.constant dense<0.000000e+00> : vector<2x8xf32>
    %2 = vector.multi_reduction <add>, %1, %cst [2] : vector<2x8x8xf32> to vector<2x8xf32>
    %3 = vector.shape_cast %2 : vector<2x8xf32> to vector<2x8x1xf32>
    %cst_2 = arith.constant 1.000000e+00 : f32
    %4 = vector.broadcast %cst_2 : f32 to vector<2x8x1xf32>
    %5 = arith.maximumf %3, %4 : vector<2x8x1xf32>
    %6 = tpu.reciprocal %5 {approx = true} : vector<2x8x1xf32> -> vector<2x8x1xf32>
    %7 = vector.broadcast %6 : vector<2x8x1xf32> to vector<2x8x8xf32>
    %8 = arith.mulf %1, %7 : vector<2x8x8xf32>
    %c0_3 = arith.constant 0 : index
    %c0_4 = arith.constant 0 : index
    %c0_5 = arith.constant 0 : index
    %9 = vector.load %arg2[%c0_3, %c0_4, %c0_5] : memref<2x8x16xf32, #tpu.memory_space<vmem>>, vector<2x8x16xf32>
    %c0_6 = arith.constant 0 : index
    %c0_7 = arith.constant 0 : index
    %10 = vector.load %arg3[%c0_6, %c0_7] : memref<16x32xf32, #tpu.memory_space<vmem>>, vector<16x32xf32>
    "tpu.trace_start"() <{level = 10 : i32, message = "gij,gjf->gif"}> : () -> ()
    %cst_8 = arith.constant dense<0.000000e+00> : vector<2x8x16xf32>
    %11 = tpu.matmul %8, %9, %cst_8 {dimension_numbers = #tpu.dot_dimension_numbers<[2], [1], [1], [2], [0, 0, 0, 1, 1, 2], [0], [0]>} : vector<2x8x8xf32>, vector<2x8x16xf32>, vector<2x8x16xf32> -> vector<2x8x16xf32>
    "tpu.trace_stop"() : () -> ()
    %12 = vector.shape_cast %11 : vector<2x8x16xf32> to vector<16x16xf32>
    %cst_9 = arith.constant dense<0.000000e+00> : vector<16x32xf32>
    %13 = tpu.matmul %12, %10, %cst_9 {dimension_numbers = #tpu.dot_dimension_numbers<[1], [0], [0], [1], [0, 0, 1, 1], [], []>} : vector<16x16xf32>, vector<16x32xf32>, vector<16x32xf32> -> vector<16x32xf32>
    %14 = vector.shape_cast %13 : vector<16x32xf32> to vector<2x8x32xf32>
    %c0_10 = arith.constant 0 : index
    %c0_11 = arith.constant 0 : index
    %15 = vector.load %arg4[%c0_10, %c0_11] : memref<1x32xf32, #tpu.memory_space<vmem>>, vector<1x32xf32>
    %16 = vector.shape_cast %15 : vector<1x32xf32> to vector<1x1x32xf32>
    %17 = vector.broadcast %16 : vector<1x1x32xf32> to vector<2x8x32xf32>
    %18 = arith.addf %14, %17 : vector<2x8x32xf32>
    %cst_12 = arith.constant 0.000000e+00 : f32
    %19 = vector.broadcast %cst_12 : f32 to vector<2x8x32xf32>
    %20 = arith.maximumf %18, %19 : vector<2x8x32xf32>
    %c0_13 = arith.constant 0 : index
    %c0_14 = arith.constant 0 : index
    %21 = vector.load %arg5[%c0_13, %c0_14] : memref<32x32xf32, #tpu.memory_space<vmem>>, vector<32x32xf32>
    "tpu.trace_start"() <{level = 10 : i32, message = "gij,gjf->gif"}> : () -> ()
    %cst_15 = arith.constant dense<0.000000e+00> : vector<2x8x32xf32>
    %22 = tpu.matmul %8, %20, %cst_15 {dimension_numbers = #tpu.dot_dimension_numbers<[2], [1], [1], [2], [0, 0, 0, 1, 1, 2], [0], [0]>} : vector<2x8x8xf32>, vector<2x8x32xf32>, vector<2x8x32xf32> -> vector<2x8x32xf32>
    "tpu.trace_stop"() : () -> ()
    %23 = vector.shape_cast %22 : vector<2x8x32xf32> to vector<16x32xf32>
    %cst_16 = arith.constant dense<0.000000e+00> : vector<16x32xf32>
    %24 = tpu.matmul %23, %21, %cst_16 {dimension_numbers = #tpu.dot_dimension_numbers<[1], [0], [0], [1], [0, 0, 1, 1], [], []>} : vector<16x32xf32>, vector<32x32xf32>, vector<16x32xf32> -> vector<16x32xf32>
    %25 = vector.shape_cast %24 : vector<16x32xf32> to vector<2x8x32xf32>
    %c0_17 = arith.constant 0 : index
    %c0_18 = arith.constant 0 : index
    %26 = vector.load %arg6[%c0_17, %c0_18] : memref<1x32xf32, #tpu.memory_space<vmem>>, vector<1x32xf32>
    %27 = vector.shape_cast %26 : vector<1x32xf32> to vector<1x1x32xf32>
    %28 = vector.broadcast %27 : vector<1x1x32xf32> to vector<2x8x32xf32>
    %29 = arith.addf %25, %28 : vector<2x8x32xf32>
    %cst_19 = arith.constant 0.000000e+00 : f32
    %30 = vector.broadcast %cst_19 : f32 to vector<2x8x32xf32>
    %31 = arith.maximumf %29, %30 : vector<2x8x32xf32>
    %cst_20 = arith.constant dense<0.000000e+00> : vector<2x32xf32>
    %32 = vector.multi_reduction <add>, %31, %cst_20 [1] : vector<2x8x32xf32> to vector<2x32xf32>
    %cst_21 = arith.constant 1.250000e-01 : f32
    %33 = vector.broadcast %cst_21 : f32 to vector<2x32xf32>
    %34 = arith.mulf %32, %33 : vector<2x32xf32>
    %c0_22 = arith.constant 0 : index
    %c0_23 = arith.constant 0 : index
    %35 = vector.load %arg7[%c0_22, %c0_23] : memref<32x128xf32, #tpu.memory_space<vmem>>, vector<32x128xf32>
    %cst_24 = arith.constant dense<0.000000e+00> : vector<2x128xf32>
    %36 = tpu.matmul %34, %35, %cst_24 {dimension_numbers = #tpu.dot_dimension_numbers<[1], [0], [0], [1], [0, 0, 1, 1], [], []>} : vector<2x32xf32>, vector<32x128xf32>, vector<2x128xf32> -> vector<2x128xf32>
    %c0_25 = arith.constant 0 : index
    %c0_26 = arith.constant 0 : index
    %37 = vector.load %arg8[%c0_25, %c0_26] : memref<1x128xf32, #tpu.memory_space<vmem>>, vector<1x128xf32>
    %38 = vector.broadcast %37 : vector<1x128xf32> to vector<2x128xf32>
    %39 = arith.addf %36, %38 : vector<2x128xf32>
    %cst_27 = arith.constant dense<0xFF800000> : vector<2xf32>
    %40 = vector.multi_reduction <maximumf>, %39, %cst_27 [1] : vector<2x128xf32> to vector<2xf32>
    %41 = vector.shape_cast %40 : vector<2xf32> to vector<2x1xf32>
    %42 = vector.broadcast %41 : vector<2x1xf32> to vector<2x128xf32>
    %43 = arith.subf %39, %42 : vector<2x128xf32>
    %44 = math.exp %43 : vector<2x128xf32>
    %cst_28 = arith.constant dense<0.000000e+00> : vector<2xf32>
    %45 = vector.multi_reduction <add>, %44, %cst_28 [1] : vector<2x128xf32> to vector<2xf32>
    %46 = vector.shape_cast %45 : vector<2xf32> to vector<2x1xf32>
    %47 = tpu.reciprocal %46 {approx = true} : vector<2x1xf32> -> vector<2x1xf32>
    %48 = vector.broadcast %47 : vector<2x1xf32> to vector<2x128xf32>
    %49 = arith.mulf %44, %48 : vector<2x128xf32>
    %c0_29 = arith.constant 0 : index
    %c0_30 = arith.constant 0 : index
    %50 = vector.load %arg9[%c0_29, %c0_30] : memref<2x128xf32, #tpu.memory_space<vmem>>, vector<2x128xf32>
    tpu.vector_store %arg9[%c0_29, %c0_30], %49 {strides = array<i32>} : memref<2x128xf32, #tpu.memory_space<vmem>>, vector<2x128xf32>,
    return
  }
  func.func @transform_0(%arg0: i32) -> (i32, i32, i32) {
    %c0_i32 = arith.constant 0 : i32
    %c0_i32_0 = arith.constant 0 : i32
    %c0_i32_1 = arith.constant 0 : i32
    return %arg0, %c0_i32, %c0_i32_0 : i32, i32, i32
  }
  func.func @transform_1(%arg0: i32) -> (i32, i32, i32) {
    %c0_i32 = arith.constant 0 : i32
    %c0_i32_0 = arith.constant 0 : i32
    %c0_i32_1 = arith.constant 0 : i32
    return %arg0, %c0_i32, %c0_i32_0 : i32, i32, i32
  }
  func.func @transform_2(%arg0: i32) -> (i32, i32) {
    %c0_i32 = arith.constant 0 : i32
    %c0_i32_0 = arith.constant 0 : i32
    %c0_i32_1 = arith.constant 0 : i32
    return %c0_i32, %c0_i32_0 : i32, i32
  }
  func.func @transform_3(%arg0: i32) -> (i32, i32) {
    %c0_i32 = arith.constant 0 : i32
    %c0_i32_0 = arith.constant 0 : i32
    %c0_i32_1 = arith.constant 0 : i32
    return %c0_i32, %c0_i32_0 : i32, i32
  }
  func.func @transform_4(%arg0: i32) -> (i32, i32) {
    %c0_i32 = arith.constant 0 : i32
    %c0_i32_0 = arith.constant 0 : i32
    %c0_i32_1 = arith.constant 0 : i32
    return %c0_i32, %c0_i32_0 : i32, i32
  }
  func.func @transform_5(%arg0: i32) -> (i32, i32) {
    %c0_i32 = arith.constant 0 : i32
    %c0_i32_0 = arith.constant 0 : i32
    %c0_i32_1 = arith.constant 0 : i32
    return %c0_i32, %c0_i32_0 : i32, i32
  }
  func.func @transform_6(%arg0: i32) -> (i32, i32) {
    %c0_i32 = arith.constant 0 : i32
    %c0_i32_0 = arith.constant 0 : i32
    %c0_i32_1 = arith.constant 0 : i32
    return %c0_i32, %c0_i32_0 : i32, i32
  }
  func.func @transform_7(%arg0: i32) -> (i32, i32) {
    %c0_i32 = arith.constant 0 : i32
    %c0_i32_0 = arith.constant 0 : i32
    %c0_i32_1 = arith.constant 0 : i32
    return %c0_i32, %c0_i32_0 : i32, i32
  }
  func.func @transform_8(%arg0: i32) -> (i32, i32) {
    %c0_i32 = arith.constant 0 : i32
    %c0_i32_0 = arith.constant 0 : i32
    return %arg0, %c0_i32 : i32, i32
  }
}

</mosaic_0001>

<bundles_post_ra>
// kernel: tpu_custom_call.1
= control target key start
LH: loop header
LB: loop body
LE: loop exit
PB: predicated region body
PF: predicated region fallthrough
CT: control target
= control target key end

     0   :  { %13 = vsyncpa [#allocation3], 0  ;;  %s1089_s0 = inlined_call_operand.hbm [shape: bf16[2,8,8], index: 0, kind: input, shape index: {}]   ;;  %s1090_s1 = inlined_call_operand.hbm [shape: f32[2,8,16], index: 1, kind: input, shape index: {}]   ;;  %s1091_s2 = inlined_call_operand.hbm [shape: f32[16,32], index: 2, kind: input, shape index: {}]   ;;  %s1092_s3 = inlined_call_operand.vmem [shape: f32[1,32], index: 3, kind: input, shape index: {}]   ;;  %s1093_s4 = inlined_call_operand.hbm [shape: f32[32,32], index: 4, kind: input, shape index: {}]   ;;  %s1094_s5 = inlined_call_operand.vmem [shape: f32[1,32], index: 5, kind: input, shape index: {}]   ;;  %s1095_s6 = inlined_call_operand.hbm [shape: f32[32,128], index: 6, kind: input, shape index: {}]   ;;  %s1096_s7 = inlined_call_operand.vmem [shape: f32[1,128], index: 7, kind: input, shape index: {}]   ;;  %s1097_s8 = inlined_call_operand.hbm [shape: f32[2,128], index: 8, kind: output, shape index: {}]  }
   0x1   :  { %14 = vsyncpa [#allocation6], 0 }
   0x2   :  { %15 = vsyncpa [#allocation9], 0 }
   0x3   :  { %16 = vsyncpa [#allocation4], 0  ;;  %s964_s27 = smov [#allocation5]  }
   0x4   :  { %s34_s28 = sshll.u32 %s964_s27, 4  ;;  %s35_s28 = int_to_ptr.vmem [resolvable:$true] %s34_s28 }
   0x5   :  { %s844_s29 = scalar_lea.vmem %s35_s28, 256  ;;  %p849_p1 = scmp.lt.s32.totalorder %s35_s28, %s35_s28 }
   0x6   :  { %p845_p0 = scmp.ne.s32.totalorder %s35_s28, %s844_s29  ;;  %p850_p2 = scmp.lt.s32.totalorder %s844_s29, %s844_s29 }
   0x8   :  { %p851_p3 = por %p850_p2, %p849_p1 }
   0xa   :  { %p852_p4 = pnand %p851_p3, %p845_p0 }
   0xc   :  { %855 = shalt.err (!%p852_p4)
}
   0xd   :  { %s965_s30 = smov 128   ;;  %s966_s9 = smov 8  }
   0xe   :  { %40 = dma.hbm_to_vmem [thread:$0]  %s1090_s1, 256, %s35_s28, [#allocation6], %s965_s30, %s965_s30, %s966_s9  }
   0xf   :  { %s967_s12 = smov [#allocation8]   ;;  %s968_s14 = smov [#allocation2]  }
  0x10   :  { %s60_s13 = sshll.u32 %s967_s12, 4  ;;  %s22_s15 = sshll.u32 %s968_s14, 4  ;;  %s61_s13 = int_to_ptr.vmem [resolvable:$true] %s60_s13  ;;  %s23_s15 = int_to_ptr.vmem [resolvable:$true] %s22_s15 }
  0x11   :  { %s864_s16 = scalar_lea.vmem %s61_s13, 512  ;;  %p869_p6 = scmp.lt.s32.totalorder %s61_s13, %s61_s13 }
  0x12   :  { %p865_p5 = scmp.ne.s32.totalorder %s61_s13, %s864_s16  ;;  %p870_p7 = scmp.lt.s32.totalorder %s864_s16, %s864_s16 }
  0x14   :  { %p871_p8 = por %p870_p7, %p869_p6 }
  0x16   :  { %p872_p9 = pnand %p871_p8, %p865_p5 }
  0x18   :  { %875 = shalt.err (!%p872_p9)
}
  0x19   :  { %66 = dma.hbm_to_vmem [thread:$0]  %s1093_s4, 512, %s61_s13, [#allocation9], %s965_s30, %s965_s30, %s966_s9  }
  0x1a   :  { %s884_s1 = scalar_lea.vmem %s23_s15, 128  ;;  %p889_p11 = scmp.lt.s32.totalorder %s23_s15, %s23_s15 }
  0x1b   :  { %p885_p10 = scmp.ne.s32.totalorder %s23_s15, %s884_s1  ;;  %p890_p12 = scmp.lt.s32.totalorder %s884_s1, %s884_s1 }
  0x1d   :  { %p891_p13 = por %p890_p12, %p889_p11 }
  0x1f   :  { %p892_p0 = pnand %p891_p13, %p885_p10 }
  0x21   :  { %895 = shalt.err (!%p892_p0)
}
  0x22   :  { %s969_s19 = smov 64   ;;  %s970_s20 = smov 4  }
  0x23   :  { %28 = dma.hbm_to_vmem [thread:$0]  %s1089_s0, 128, %s23_s15, [#allocation3], %s969_s19, %s969_s19, %s970_s20  }
  0x24   :  { %s971_s23 = smov [#allocation7]   ;;  %s972_s25 = smov [#allocation10]  }
  0x25   :  { %s46_s24 = sshll.u32 %s971_s23, 4  ;;  %s74_s26 = sshll.u32 %s972_s25, 4  ;;  %s47_s24 = int_to_ptr.vmem [resolvable:$true] %s46_s24  ;;  %s75_s26 = int_to_ptr.vmem [resolvable:$true] %s74_s26 }
  0x26   :  { %s904_s4 = scalar_lea.vmem %s47_s24, 256  ;;  %p909_p2 = scmp.lt.s32.totalorder %s47_s24, %s47_s24 }
  0x27   :  { %p905_p1 = scmp.ne.s32.totalorder %s47_s24, %s904_s4  ;;  %p910_p3 = scmp.lt.s32.totalorder %s904_s4, %s904_s4 }
  0x29   :  { %p911_p4 = por %p910_p3, %p909_p2 }
  0x2b   :  { %p912_p5 = pnand %p911_p4, %p905_p1 }
  0x2d   :  { %915 = shalt.err (!%p912_p5)
}
  0x2e   :  { %52 = dma.hbm_to_vmem [thread:$0]  %s1091_s2, 256, %s47_s24, [#allocation6], %s965_s30, %s965_s30, %s966_s9  }
  0x2f   :  { %s924_s0 = scalar_lea.vmem %s75_s26, 512  ;;  %p929_p7 = scmp.lt.s32.totalorder %s75_s26, %s75_s26 }
  0x30   :  { %p925_p6 = scmp.ne.s32.totalorder %s75_s26, %s924_s0  ;;  %p930_p8 = scmp.lt.s32.totalorder %s924_s0, %s924_s0 }
  0x32   :  { %p931_p9 = por %p930_p8, %p929_p7 }
  0x34   :  { %p932_p10 = pnand %p931_p9, %p925_p6 }
  0x36   :  { %935 = shalt.err (!%p932_p10)
}
  0x37   :  { %80 = dma.hbm_to_vmem [thread:$0]  %s1095_s6, 512, %s75_s26, [#allocation9], %s965_s30, %s965_s30, %s966_s9  }
  0x38   :  { %956 = dma.done.wait [#allocation3], 128  }
  0x39   :  { %957 = vsyncadd [#allocation3], 4294967168 }
  0x3a   :  { %958 = dma.done.wait [#allocation6], 512  }
  0x3b   :  { %959 = vsyncadd [#allocation6], 4294966784 }
  0x3c   :  { %960 = dma.done.wait [#allocation9], 1024  }
  0x3d   :  { %961 = vsyncadd [#allocation9], 4294966272  ;;  %v741_v0 = vld [vmem:[#allocation2] sm:$0xff]   ;;  %vm102_vm0 = vcmask 64512   ;;  %v115_v5 = vld [vmem:[#allocation5] sm:$0xff]  ;;  %v973_v6 = vmov 0.0  }
  0x3e   :  { %v742_v1 = vunpack.c.l.bf16 %v741_v0  ;;  %v743_v2 = vunpack.c.h.bf16 %v741_v0  ;;  %767 = vmatprep.subr.mxu0 %v973_v6  ;;  %vm974_vm1 = vmmov 0   ;;  %772 = vmatprep.subr.mxu1 %v973_v6  ;;  %v116_v7 = vld [vmem:[#allocation5 + $0x8] sm:$0xff]  ;;  %v118_v16 = vld [vmem:[#allocation7 + $0x8] sm:$0xff]  ;;  %v117_v17 = vld [vmem:[#allocation7] sm:$0xff]  ;;  %vm265_vm2 = vcmask 130048   ;;  %s975_s11 = smov [#allocation11]  }
  0x3f   :  { %769 = vmatprep.mubr.msk.f32.mxu0 %vm974_vm1, %v973_v6  ;;  %768 = vmatpush3.msra.mxu0 %v115_v5  ;;  %v732_v22 = vld [vmem:[%s1092_s3] ss:$0 sm:$0xff]  ;;  %v360_v30 = vld [vmem:[#allocation8 + $0x10] sm:$0xff]  ;;  %v359_v31 = vld [vmem:[#allocation8 + $0x8] sm:$0xff]  ;;  %vm502_vm3 = vcmask 261120   ;;  %vm624_vm4 = vcmask 1041409  }
  0x40   :  { %v103_v3 = vsel %vm102_vm0, %v742_v1, 0.0  ;;  %v106_v4 = vsel %vm102_vm0, %v743_v2, 0.0  ;;  %774 = vmatprep.mubr.msk.f32.mxu1 %vm974_vm1, %v973_v6  ;;  %773 = vmatpush3.msra.mxu1 %v116_v7  ;;  %v361_v29 = vld [vmem:[#allocation8 + $0x18] sm:$0xff]  ;;  %v358_v32 = vld [vmem:[#allocation8] sm:$0xff]  ;;  %v613_v38 = vld [vmem:[#allocation10 + $0x10] sm:$0xff]  ;;  %vm698_vm5 = vcmask 1041408  }
  0x41   :  { %104 = vadd.xlane.f32.xlu0 %v103_v3  ;;  %784 = vmatprep.subr.mxu1 %v973_v6  ;;  %v614_v37 = vld [vmem:[#allocation10 + $0x18] sm:$0xff]  ;;  %v612_v39 = vld [vmem:[#allocation10 + $0x8] sm:$0xff]  ;;  %v611_v40 = vld [vmem:[#allocation10] sm:$0xff]  ;;  %s717_s12 = sshll.u32 %s975_s11, 4  ;;  %s718_s12 = int_to_ptr.vmem [resolvable:$true] %s717_s12 }
  0x42   :  { %777 = vmatprep.subr.mxu0 %v118_v16  ;;  %v737_v41 = vld [vmem:[%s1094_s5] ss:$0 sm:$0xff]  ;;  %p941_p12 = scmp.lt.s32.totalorder %s718_s12, %s718_s12 }
  0x45   :  { %107 = vadd.xlane.f32.xlu0 %v106_v4 }
  0xca   :  { %v105_v8 = vpop.xlane.xlu0 %104 }
  0xcb   :  { %v109_v9 = vmax.f32 %v105_v8, 1.0 }
  0xcd   :  { %828 = vrcp.f32 %v109_v9 }
  0xce   :  { %v108_v10 = vpop.xlane.xlu0 %107 }
  0xcf   :  { %v110_v11 = vmax.f32 %v108_v10, 1.0 }
  0xd1   :  { %830 = vrcp.f32 %v110_v11 }
  0xda   :  { %v829_v12 = vpop.eup %828 }
  0xdb   :  { %v113_v13 = vmul.f32 %v829_v12, %v742_v1  ;;  %v738_v1 = vld [vmem:[%s1096_s7] ss:$0 sm:$0xff]  ;;  %s936_s7 = scalar_lea.vmem %s718_s12, 32 }
  0xdc   :  { %p937_p11 = scmp.ne.s32.totalorder %s718_s12, %s936_s7  ;;  %p942_p13 = scmp.lt.s32.totalorder %s936_s7, %s936_s7 }
  0xdd   :  { %770 = vmatmul.mubr.msk.f32.vlgmr.msra.gmra.mxu0 %vm102_vm0, %v113_v13 }
  0xde   :  { %v831_v14 = vpop.eup %830  ;;  %778 = vmatpush3.msra.mxu0 %v118_v16  ;;  %p943_p0 = por %p942_p13, %p941_p12 }
  0xdf   :  { %v114_v15 = vmul.f32 %v831_v14, %v743_v2  ;;  %779 = vmatprep.subr.mxu0 %v117_v17 }
  0xe0   :  { %780 = vmatpush3.msra.mxu0 %v117_v17  ;;  %p944_p1 = pnand %p943_p0, %p937_p11 }
  0xe1   :  { %775 = vmatmul.mubr.msk.f32.vlgmr.msra.gmra.mxu1 %vm102_vm0, %v114_v15  ;;  %789 = vmatprep.subr.mxu0 %v973_v6 }
  0xe2   :  { %786 = vmatprep.mubr.msk.f32.mxu1 %vm974_vm1, %v973_v6 }
 0x19d   :  { %v188_v18 = vpop.f32.mrf.mxu0 }
 0x19e   :  { %781 = vmatprep.mubr.msk.f32.mxu0 %vm265_vm2, %v188_v18 }
 0x19f   :  { %v771_v19 = vpop.f32.mrf.mxu0 }
 0x1a1   :  { %v261_v20 = vpop.f32.mrf.mxu1 }
 0x1a2   :  { %782 = vmatmul.mubr.msk.f32.vlgmr.msra.gmra.mxu0 %vm265_vm2, %v261_v20 }
 0x1a3   :  { %v776_v21 = vpop.f32.mrf.mxu1  ;;  %791 = vmatprep.mubr.msk.f32.mxu0 %vm974_vm1, %v973_v6 }
 0x262   :  { %v783_v23 = vpop.f32.mrf.mxu0 }
 0x263   :  { %v355_v24 = vadd.f32 %v783_v23, %v732_v22 }
 0x264   :  { %v338_v25 = vpop.f32.mrf.mxu0 }
 0x265   :  { %v357_v26 = vmax.f32 %v355_v24, 0.0  ;;  %v354_v27 = vadd.f32 %v732_v22, %v338_v25 }
 0x267   :  { %v356_v28 = vmax.f32 %v354_v27, 0.0  ;;  %790 = vmatpush3.msra.mxu0 %v357_v26 }
 0x268   :  { %792 = vmatmul.mubr.msk.f32.vlgmr.msra.gmra.mxu0 %vm102_vm0, %v114_v15  ;;  %805 = vmatprep.subr.mxu0 %v973_v6 }
 0x269   :  { %785 = vmatpush3.msra.mxu1 %v356_v28  ;;  %813 = vmatprep.mubr.msk.f32.mxu0 %vm974_vm1, %v973_v6 }
 0x26a   :  { %787 = vmatmul.mubr.msk.f32.vlgmr.msra.gmra.mxu1 %vm102_vm0, %v113_v13  ;;  %794 = vmatprep.subr.mxu1 %v361_v29 }
 0x26b   :  { %795 = vmatpush3.msra.mxu1 %v361_v29  ;;  %806 = vmatpush3.msra.mxu0 %v614_v37 }
 0x26c   :  { %796 = vmatprep.subr.mxu1 %v360_v30  ;;  %807 = vmatprep.subr.mxu0 %v973_v6 }
 0x26d   :  { %797 = vmatpush3.msra.mxu1 %v360_v30  ;;  %808 = vmatpush3.msra.mxu0 %v613_v38 }
 0x26e   :  { %798 = vmatprep.subr.mxu1 %v359_v31  ;;  %809 = vmatprep.subr.mxu0 %v973_v6 }
 0x26f   :  { %799 = vmatpush3.msra.mxu1 %v359_v31  ;;  %810 = vmatpush3.msra.mxu0 %v612_v39 }
 0x270   :  { %800 = vmatprep.subr.mxu1 %v358_v32  ;;  %811 = vmatprep.subr.mxu0 %v973_v6 }
 0x271   :  { %801 = vmatpush3.msra.mxu1 %v358_v32  ;;  %812 = vmatpush3.msra.mxu0 %v611_v40 }
 0x328   :  { %v498_v33 = vpop.f32.mrf.mxu0 }
 0x32a   :  { %v428_v34 = vpop.f32.mrf.mxu1  ;;  %v793_v35 = vpop.f32.mrf.mxu0 }
 0x32b   :  { %802 = vmatprep.mubr.msk.f32.mxu1 %vm502_vm3, %v428_v34 }
 0x32c   :  { %v788_v36 = vpop.f32.mrf.mxu1  ;;  %803 = vmatmul.mubr.msk.f32.vlgmr.msra.gmra.mxu1 %vm502_vm3, %v498_v33 }
 0x3ec   :  { %v804_v42 = vpop.f32.mrf.mxu1 }
 0x3ed   :  { %v592_v43 = vadd.f32 %v804_v42, %v737_v41 }
 0x3ee   :  { %v575_v44 = vpop.f32.mrf.mxu1 }
 0x3ef   :  { %v594_v45 = vmax.f32 %v592_v43, 0.0  ;;  %v591_v46 = vadd.f32 %v737_v41, %v575_v44 }
 0x3f1   :  { %v602_v47 = vsel %vm502_vm3, %v594_v45, 0.0  ;;  %v593_v48 = vmax.f32 %v591_v46, 0.0 }
 0x3f2   :  { %v603_v49 = vrot.slane %v602_v47, 4 }
 0x3f3   :  { %v595_v50 = vsel %vm502_vm3, %v593_v48, 0.0 }
 0x3f4   :  { %v604_v51 = vadd.f32 %v603_v49, %v602_v47  ;;  %v596_v52 = vrot.slane %v595_v50, 4 }
 0x3f6   :  { %v605_v53 = vrot.slane %v604_v51, 2  ;;  %v597_v54 = vadd.f32 %v596_v52, %v595_v50 }
 0x3f8   :  { %v606_v55 = vadd.f32 %v605_v53, %v604_v51  ;;  %v598_v56 = vrot.slane %v597_v54, 2 }
 0x3fa   :  { %v607_v57 = vrot.slane %v606_v55, 1  ;;  %v599_v58 = vadd.f32 %v598_v56, %v597_v54 }
 0x3fc   :  { %v608_v59 = vadd.f32 %v607_v57, %v606_v55  ;;  %v600_v60 = vrot.slane %v599_v58, 1 }
 0x3fe   :  { %v601_v61 = vadd.f32 %v600_v60, %v599_v58  ;;  %v610_v62 = vmul.f32 0.125, %v608_v59 }
 0x400   :  { %v609_v63 = vmul.f32 0.125, %v601_v61 }
 0x402   :  { %v625_v0 = vsel %vm624_vm4, %v610_v62, %v609_v63 }
 0x403   :  { %814 = vmatmul.mubr.msk.f32.vlgmr.msra.gmra.mxu0 %vm502_vm3, %v625_v0 }
 0x4c3   :  { %v694_v2 = vpop.f32.mrf.mxu0 }
 0x4c4   :  { %v695_v3 = vadd.f32 %v738_v1, %v694_v2 }
 0x4c5   :  { %v815_v4 = vpop.f32.mrf.mxu0 }
 0x4c6   :  { %v699_v5 = vsel %vm698_vm5, %v695_v3, -inf }
 0x4c7   :  { %700 = vmax.xlane.f32.xlu1 %v699_v5 }
 0x550   :  { %v701_v6 = vpop.xlane.xlu1 %700 }
 0x551   :  { %v702_v7 = vsub.f32 %v695_v3, %v701_v6 }
 0x553   :  { %v703_v8 = vmul.f32 1.442695, %v702_v7 }
 0x555   :  { %832 = vpow2.f32 %v703_v8 }
 0x562   :  { %v833_v9 = vpop.eup %832 }
 0x563   :  { %v705_v10 = vsel %vm698_vm5, %v833_v9, 0.0 }
 0x564   :  { %706 = vadd.xlane.f32.xlu1 %v705_v10 }
 0x5ed   :  { %v707_v11 = vpop.xlane.xlu1 %706 }
 0x5ee   :  { %834 = vrcp.f32 %v707_v11 }
 0x5fb   :  { %v835_v12 = vpop.eup %834 }
 0x5fc   :  { %v709_v13 = vmul.f32 %v835_v12, %v833_v9 }
 0x5fe   :  { %710 = vst [vmem:[#allocation11] sm:$0x3] %v709_v13 }
 0x5ff   :  { %947 = shalt.err (!%p944_p1)
}
 0x600   :  { %720 = dma.vmem_to_hbm [thread:$0]  %s718_s12, 32, %s1097_s8, [#allocation4]  }
 0x601   :  { %962 = dma.done.wait [#allocation4], 32  }
 0x602   :  { %963 = vsyncadd [#allocation4], 4294967264 }
 0x603   :  { %724 = vsyncpa [#allocation3], 1 }
 0x604   :  { %725 = vsyncpa [#allocation6], 1 }
 0x605   :  { %726 = vsyncpa [#allocation9], 1 }
 0x606   :  { %727 = vsyncpa [#allocation4], 1 }

</bundles_post_ra>
